<compile_context>
chip_gen: v7x
topology: tpu7x:2x2x1
jax: 0.10.0
libtpu: 0.0.40
codegen_flags: <defaults>
</compile_context>

<pallas_src>
import functools

import jax
import jax.numpy as jnp
from jax.experimental import pallas as pl
from jax.experimental.pallas import tpu as pltpu


def fused_gcn_kernel(a_ref, x_ref, w1_ref, b1_ref, w2_ref, b2_ref, o_ref, *,
                     num_classes: int):
    a = a_ref[...]                     # (Np, Np) bf16 normalized adjacency
    x = x_ref[...]                     # (Np, Fp) bf16 zero-padded features

    # ---- Layer 1:  H = relu(A @ (X @ W1) + b1)  -----------------------------
    # transform-then-aggregate: intermediates are (Np, 128) lane-dense; MXU
    # pass count is identical to aggregate-first since all K <= 128.
    xw = jnp.dot(x, w1_ref[...], preferred_element_type=jnp.float32)      # (Np, Hp) f32
    h = jnp.dot(a, xw.astype(jnp.bfloat16),
                preferred_element_type=jnp.float32)                        # (Np, Hp) f32
    h = jnp.maximum(h + b1_ref[...], 0.0)
    # F.dropout with p=0 (module default) / eval mode is the identity.
    # TODO(synk): training-mode dropout with p>0 needs pltpu.prng_* masking.

    # ---- Layer 2:  Z = A @ (H @ W2) + b2  -----------------------------------
    hw = jnp.dot(h.astype(jnp.bfloat16), w2_ref[...],
                 preferred_element_type=jnp.float32)                       # (Np, Cp) f32
    z = jnp.dot(a, hw.astype(jnp.bfloat16),
                preferred_element_type=jnp.float32) + b2_ref[...]          # (Np, Cp) f32

    # ---- log_softmax over the REAL classes only (padded lanes masked out) ---
    lane = jax.lax.broadcasted_iota(jnp.int32, z.shape, dimension=1)
    valid = lane < num_classes
    zm = jnp.where(valid, z, jnp.full_like(z, -1e30))
    m = jnp.max(zm, axis=-1, keepdims=True)
    e = jnp.where(valid, jnp.exp(zm - m), 0.0)
    lse = jnp.log(jnp.sum(e, axis=-1, keepdims=True)) + m
    o_ref[...] = (zm - lse).astype(o_ref.dtype)


def _round_up(x, m):
    return (x + m - 1) // m * m


def prepare_gcn_constants(a_hat, params, num_classes):
    """One-time per-graph/per-model padding + bf16 casts (off the per-call path)."""
    w1_t, b1, w2_t, b2 = params
    n = a_hat.shape[0]
    f_in, hidden = w1_t.shape

    n_p = _round_up(n, 16)               # bf16 sublane tile (16 rows / vreg)
    f_p = _round_up(f_in, 128)           # lane-dense features
    h_p = _round_up(hidden, 128)         # lane-dense hidden
    c_p = _round_up(num_classes, 128)    # lane-dense logits (unmasked stores)

    a_p = jnp.zeros((n_p, n_p), jnp.float32).at[:n, :n].set(a_hat).astype(jnp.bfloat16)
    w1_p = jnp.zeros((f_p, h_p), jnp.float32).at[:f_in, :hidden].set(w1_t
                                                                     ).astype(jnp.bfloat16)
    b1_p = jnp.zeros((1, h_p), jnp.float32).at[:, :hidden].set(b1)
    w2_p = jnp.zeros((h_p, c_p), jnp.float32).at[:hidden, :num_classes].set(w2_t
                                                                            ).astype(jnp.bfloat16)
    b2_p = jnp.zeros((1, c_p), jnp.float32).at[:, :num_classes].set(b2)
    return a_p, w1_p, b1_p, w2_p, b2_p


@functools.partial(jax.jit, static_argnames=("num_classes",))
def gcn_forward(x, a_p, w1_p, b1_p, w2_p, b2_p, *, num_classes):
    """Fused 2-layer GCN forward: log_softmax(A(relu(A(X W1) + b1))W2 + b2)."""
    n, f_in = x.shape
    n_p = a_p.shape[0]
    f_p, h_p = w1_p.shape
    c_p = w2_p.shape[1]

    # Only x is padded/cast per call; all constants were prepared once.
    x_p = jnp.zeros((n_p, f_p), jnp.float32).at[:n, :f_in].set(x).astype(jnp.bfloat16)

    kernel = functools.partial(fused_gcn_kernel, num_classes=num_classes)

    flops = (2 * n_p * f_p * h_p          # X @ W1
             + 2 * n_p * n_p * h_p        # A @ (X W1)
             + 2 * n_p * h_p * c_p        # H @ W2
             + 2 * n_p * n_p * c_p)       # A @ (H W2)
    io_bytes = ((a_p.size + x_p.size + w1_p.size + w2_p.size) * 2
                + (b1_p.size + b2_p.size) * 4
                + n_p * c_p * 4)

    # Explicit VMEM budget: double-buffered I/O blocks + f32 intermediates,
    # with headroom; capped at 64 MiB so it is valid on v7x too.
    resident = 2 * io_bytes
    scratch = 3 * n_p * max(h_p, c_p) * 4
    vmem_limit = int(min(resident + scratch + (4 << 20), 64 << 20))

    out_p = pl.pallas_call(
        kernel,
        out_shape=jax.ShapeDtypeStruct((n_p, c_p), jnp.float32),
        grid=(1,),
        in_specs=[
            pl.BlockSpec((n_p, n_p), lambda i: (0, 0)),
            pl.BlockSpec((n_p, f_p), lambda i: (0, 0)),
            pl.BlockSpec((f_p, h_p), lambda i: (0, 0)),
            pl.BlockSpec((1, h_p), lambda i: (0, 0)),
            pl.BlockSpec((h_p, c_p), lambda i: (0, 0)),
            pl.BlockSpec((1, c_p), lambda i: (0, 0)),
        ],
        out_specs=pl.BlockSpec((n_p, c_p), lambda i: (0, 0)),
        compiler_params=pltpu.CompilerParams(
            dimension_semantics=("arbitrary",),
            vmem_limit_bytes=vmem_limit),
        cost_estimate=pl.CostEstimate(flops=flops,
                                      transcendentals=n_p * c_p + n_p,
                                      bytes_accessed=io_bytes),
    )(a_p, x_p, w1_p, b1_p, w2_p, b2_p)

    return out_p[:n, :num_classes]


def build_normalized_adjacency(edge_index, num_nodes):
    """Dense D^-1/2 (A + I) D^-1/2 matching PyG GCNConv message passing.

    Each directed edge (src=row, dst=col) contributes 1 to A[dst, src]
    (duplicate edges accumulate, as PyG scatter-adds them); self-loops are
    added; degrees are row-sums of (A + I).
    """
    row, col = edge_index
    a = jnp.zeros((num_nodes, num_nodes), jnp.float32)
    a = a.at[col, row].add(1.0)                        # scatter-add duplicates
    a = a + jnp.eye(num_nodes, dtype=jnp.float32)      # self loops
    deg = jnp.sum(a, axis=1)
    dinv_sqrt = jnp.where(deg > 0, 1.0 / jnp.sqrt(deg), 0.0)
    return a * dinv_sqrt[:, None] * dinv_sqrt[None, :]


def glorot(key, fan_in, fan_out):
    lim = (6.0 / (fan_in + fan_out)) ** 0.5
    return jax.random.uniform(key, (fan_in, fan_out), jnp.float32, -lim, lim)


if __name__ == "__main__":
    key = jax.random.PRNGKey(0)
    N, F_IN, HIDDEN, NUM_CLASSES, E = 32, 16, 32, 8, 64

    k_x, k_src, k_dst, k_w1, k_w2 = jax.random.split(key, 5)

    # data.x and data.edge_index
    x = jax.random.normal(k_x, (N, F_IN), dtype=jnp.float32)
    src = jax.random.randint(k_src, (E,), 0, N)
    dst = jax.random.randint(k_dst, (E,), 0, N)
    edge_index = jnp.stack([src, dst], axis=0)  # [2, E]

    a_hat = build_normalized_adjacency(edge_index, N)

    # GCNConv params: lin.weight is [out, in] (glorot), bias zeros.
    # We pass W pre-transposed as [in, out].
    w1_t = glorot(k_w1, F_IN, HIDDEN)
    b1 = jnp.zeros((1, HIDDEN), jnp.float32)
    w2_t = glorot(k_w2, HIDDEN, NUM_CLASSES)
    b2 = jnp.zeros((1, NUM_CLASSES), jnp.float32)

    # One-time constant prep (padding + bf16 casts hoisted off the call path).
    consts = prepare_gcn_constants(a_hat, (w1_t, b1, w2_t, b2), NUM_CLASSES)
    consts = jax.block_until_ready(consts)

    out = gcn_forward(x, *consts, num_classes=NUM_CLASSES)
    jax.block_until_ready(out)

    # Sanity vs pure-JAX f32 reference (bf16 MXU operands => ~1e-2 level error).
    h_ref = jnp.maximum(a_hat @ (x @ w1_t) + b1, 0.0)
    ref = jax.nn.log_softmax(a_hat @ (h_ref @ w2_t) + b2, axis=-1)

    assert out.shape == (N, NUM_CLASSES)
    assert bool(jnp.all(jnp.isfinite(out)))
    assert float(jnp.max(jnp.abs(out - ref))) < 1e-1
    print("KERNEL_OK")
</pallas_src>

<mosaic_0001>
module attributes {stable_mosaic.version = 11 : i64} {
  func.func @fused_gcn_kernel(%arg0: i32, %arg1: memref<32x32xbf16, #tpu.memory_space<vmem>>, %arg2: memref<32x128xbf16, #tpu.memory_space<vmem>>, %arg3: memref<128x128xbf16, #tpu.memory_space<vmem>>, %arg4: memref<1x128xf32, #tpu.memory_space<vmem>>, %arg5: memref<128x128xbf16, #tpu.memory_space<vmem>>, %arg6: memref<1x128xf32, #tpu.memory_space<vmem>>, %arg7: memref<32x128xf32, #tpu.memory_space<vmem>>) attributes {dimension_semantics = [#tpu.dimension_semantics<arbitrary>], iteration_bounds = array<i64: 1>, scalar_prefetch = 0 : i64, scratch_operands = 0 : i64, tpu.core_type = #tpu.core_type<tc>, window_params = [{pipeline_mode = #tpu.pipeline_mode<synchronous>, transform_indices = @transform_0, window_bounds = array<i64: 32, 32>}, {pipeline_mode = #tpu.pipeline_mode<synchronous>, transform_indices = @transform_1, window_bounds = array<i64: 32, 128>}, {pipeline_mode = #tpu.pipeline_mode<synchronous>, transform_indices = @transform_2, window_bounds = array<i64: 128, 128>}, {pipeline_mode = #tpu.pipeline_mode<synchronous>, transform_indices = @transform_3, window_bounds = array<i64: 1, 128>}, {pipeline_mode = #tpu.pipeline_mode<synchronous>, transform_indices = @transform_4, window_bounds = array<i64: 128, 128>}, {pipeline_mode = #tpu.pipeline_mode<synchronous>, transform_indices = @transform_5, window_bounds = array<i64: 1, 128>}, {pipeline_mode = #tpu.pipeline_mode<synchronous>, transform_indices = @transform_6, window_bounds = array<i64: 32, 128>}]} {
    %c0 = arith.constant 0 : index
    %c0_0 = arith.constant 0 : index
    %0 = vector.load %arg1[%c0, %c0_0] : memref<32x32xbf16, #tpu.memory_space<vmem>>, vector<32x32xbf16>
    %c0_1 = arith.constant 0 : index
    %c0_2 = arith.constant 0 : index
    %1 = vector.load %arg2[%c0_1, %c0_2] : memref<32x128xbf16, #tpu.memory_space<vmem>>, vector<32x128xbf16>
    %c0_3 = arith.constant 0 : index
    %c0_4 = arith.constant 0 : index
    %2 = vector.load %arg3[%c0_3, %c0_4] : memref<128x128xbf16, #tpu.memory_space<vmem>>, vector<128x128xbf16>
    %cst = arith.constant dense<0.000000e+00> : vector<32x128xf32>
    %3 = tpu.matmul %1, %2, %cst {dimension_numbers = #tpu.dot_dimension_numbers<[1], [0], [0], [1], [0, 0, 1, 1], [], []>} : vector<32x128xbf16>, vector<128x128xbf16>, vector<32x128xf32> -> vector<32x128xf32>
    %4 = arith.truncf %3 : vector<32x128xf32> to vector<32x128xbf16>
    %cst_5 = arith.constant dense<0.000000e+00> : vector<32x128xf32>
    %5 = tpu.matmul %0, %4, %cst_5 {dimension_numbers = #tpu.dot_dimension_numbers<[1], [0], [0], [1], [0, 0, 1, 1], [], []>} : vector<32x32xbf16>, vector<32x128xbf16>, vector<32x128xf32> -> vector<32x128xf32>
    %c0_6 = arith.constant 0 : index
    %c0_7 = arith.constant 0 : index
    %6 = vector.load %arg4[%c0_6, %c0_7] : memref<1x128xf32, #tpu.memory_space<vmem>>, vector<1x128xf32>
    %7 = vector.broadcast %6 : vector<1x128xf32> to vector<32x128xf32>
    %8 = arith.addf %5, %7 : vector<32x128xf32>
    %cst_8 = arith.constant 0.000000e+00 : f32
    %9 = vector.broadcast %cst_8 : f32 to vector<32x128xf32>
    %10 = arith.maximumf %8, %9 : vector<32x128xf32>
    %11 = arith.truncf %10 : vector<32x128xf32> to vector<32x128xbf16>
    %c0_9 = arith.constant 0 : index
    %c0_10 = arith.constant 0 : index
    %12 = vector.load %arg5[%c0_9, %c0_10] : memref<128x128xbf16, #tpu.memory_space<vmem>>, vector<128x128xbf16>
    %cst_11 = arith.constant dense<0.000000e+00> : vector<32x128xf32>
    %13 = tpu.matmul %11, %12, %cst_11 {dimension_numbers = #tpu.dot_dimension_numbers<[1], [0], [0], [1], [0, 0, 1, 1], [], []>} : vector<32x128xbf16>, vector<128x128xbf16>, vector<32x128xf32> -> vector<32x128xf32>
    %14 = arith.truncf %13 : vector<32x128xf32> to vector<32x128xbf16>
    %cst_12 = arith.constant dense<0.000000e+00> : vector<32x128xf32>
    %15 = tpu.matmul %0, %14, %cst_12 {dimension_numbers = #tpu.dot_dimension_numbers<[1], [0], [0], [1], [0, 0, 1, 1], [], []>} : vector<32x32xbf16>, vector<32x128xbf16>, vector<32x128xf32> -> vector<32x128xf32>
    %c0_13 = arith.constant 0 : index
    %c0_14 = arith.constant 0 : index
    %16 = vector.load %arg6[%c0_13, %c0_14] : memref<1x128xf32, #tpu.memory_space<vmem>>, vector<1x128xf32>
    %17 = vector.broadcast %16 : vector<1x128xf32> to vector<32x128xf32>
    %18 = arith.addf %15, %17 : vector<32x128xf32>
    %19 = tpu.iota {dimensions = array<i32: 1>} : vector<32x128xi32>
    %c8_i32 = arith.constant 8 : i32
    %20 = vector.broadcast %c8_i32 : i32 to vector<32x128xi32>
    %21 = arith.cmpi slt, %19, %20 : vector<32x128xi32>
    %cst_15 = arith.constant -1.000000e+30 : f32
    %22 = vector.broadcast %cst_15 : f32 to vector<32x128xf32>
    %23 = arith.select %21, %18, %22 : vector<32x128xi1>, vector<32x128xf32>
    %cst_16 = arith.constant dense<0xFF800000> : vector<32xf32>
    %24 = vector.multi_reduction <maximumf>, %23, %cst_16 [1] : vector<32x128xf32> to vector<32xf32>
    %25 = vector.shape_cast %24 : vector<32xf32> to vector<32x1xf32>
    %26 = vector.broadcast %25 : vector<32x1xf32> to vector<32x128xf32>
    %27 = arith.subf %23, %26 : vector<32x128xf32>
    %28 = math.exp %27 : vector<32x128xf32>
    %cst_17 = arith.constant 0.000000e+00 : f32
    %29 = vector.broadcast %cst_17 : f32 to vector<32x128xf32>
    %30 = arith.select %21, %28, %29 : vector<32x128xi1>, vector<32x128xf32>
    %cst_18 = arith.constant dense<0.000000e+00> : vector<32xf32>
    %31 = vector.multi_reduction <add>, %30, %cst_18 [1] : vector<32x128xf32> to vector<32xf32>
    %32 = vector.shape_cast %31 : vector<32xf32> to vector<32x1xf32>
    %33 = math.log %32 : vector<32x1xf32>
    %34 = arith.addf %33, %25 : vector<32x1xf32>
    %35 = vector.broadcast %34 : vector<32x1xf32> to vector<32x128xf32>
    %36 = arith.subf %23, %35 : vector<32x128xf32>
    %c0_19 = arith.constant 0 : index
    %c0_20 = arith.constant 0 : index
    %37 = vector.load %arg7[%c0_19, %c0_20] : memref<32x128xf32, #tpu.memory_space<vmem>>, vector<32x128xf32>
    tpu.vector_store %arg7[%c0_19, %c0_20], %36 {strides = array<i32>} : memref<32x128xf32, #tpu.memory_space<vmem>>, vector<32x128xf32>,
    return
  }
  func.func @transform_0(%arg0: i32) -> (i32, i32) {
    %c0_i32 = arith.constant 0 : i32
    %c0_i32_0 = arith.constant 0 : i32
    %c0_i32_1 = arith.constant 0 : i32
    return %c0_i32, %c0_i32_0 : i32, i32
  }
  func.func @transform_1(%arg0: i32) -> (i32, i32) {
    %c0_i32 = arith.constant 0 : i32
    %c0_i32_0 = arith.constant 0 : i32
    %c0_i32_1 = arith.constant 0 : i32
    return %c0_i32, %c0_i32_0 : i32, i32
  }
  func.func @transform_2(%arg0: i32) -> (i32, i32) {
    %c0_i32 = arith.constant 0 : i32
    %c0_i32_0 = arith.constant 0 : i32
    %c0_i32_1 = arith.constant 0 : i32
    return %c0_i32, %c0_i32_0 : i32, i32
  }
  func.func @transform_3(%arg0: i32) -> (i32, i32) {
    %c0_i32 = arith.constant 0 : i32
    %c0_i32_0 = arith.constant 0 : i32
    %c0_i32_1 = arith.constant 0 : i32
    return %c0_i32, %c0_i32_0 : i32, i32
  }
  func.func @transform_4(%arg0: i32) -> (i32, i32) {
    %c0_i32 = arith.constant 0 : i32
    %c0_i32_0 = arith.constant 0 : i32
    %c0_i32_1 = arith.constant 0 : i32
    return %c0_i32, %c0_i32_0 : i32, i32
  }
  func.func @transform_5(%arg0: i32) -> (i32, i32) {
    %c0_i32 = arith.constant 0 : i32
    %c0_i32_0 = arith.constant 0 : i32
    %c0_i32_1 = arith.constant 0 : i32
    return %c0_i32, %c0_i32_0 : i32, i32
  }
  func.func @transform_6(%arg0: i32) -> (i32, i32) {
    %c0_i32 = arith.constant 0 : i32
    %c0_i32_0 = arith.constant 0 : i32
    %c0_i32_1 = arith.constant 0 : i32
    return %c0_i32, %c0_i32_0 : i32, i32
  }
}

</mosaic_0001>

<bundles_post_ra>
// kernel: gcn_forward.1
= control target key start
LH: loop header
LB: loop body
LE: loop exit
PB: predicated region body
PF: predicated region fallthrough
CT: control target
= control target key end

     0   :  { %11 = vsyncpa [#allocation3], 0  ;;  %s660_s21 = smov [#allocation2]   ;;  %s776_s0 = inlined_call_operand.vmem [shape: bf16[32,32], index: 0, kind: input, shape index: {}]   ;;  %s777_s1 = inlined_call_operand.vmem [shape: bf16[32,128], index: 1, kind: input, shape index: {}]   ;;  %s778_s2 = inlined_call_operand.vmem [shape: bf16[128,128], index: 2, kind: input, shape index: {}]   ;;  %s779_s3 = inlined_call_operand.vmem [shape: f32[1,128], index: 3, kind: input, shape index: {}]   ;;  %s780_s4 = inlined_call_operand.hbm [shape: bf16[128,128], index: 4, kind: input, shape index: {}]   ;;  %s781_s5 = inlined_call_operand.vmem [shape: f32[1,128], index: 5, kind: input, shape index: {}]   ;;  %s782_s6 = inlined_call_operand.vmem [shape: f32[32,128], index: 6, kind: output, shape index: {}]  }
   0x1   :  { %s25_s22 = sshll.u32 %s660_s21, 4  ;;  %s636_s25 = scalar_lea.hbm %s780_s4, 1024  ;;  %s26_s22 = int_to_ptr.vmem [resolvable:$true] %s25_s22 }
   0x2   :  { %p637_p0 = scmp.ne.s32.totalorder %s780_s4, %s636_s25  ;;  %p640_p1 = scmp.lt.u32.totalorder %s636_s25, %s780_s4 }
   0x4   :  { %p642_p2 = pnand %p640_p1, %p637_p0 }
   0x6   :  { %645 = shalt.err (!%p642_p2)
}
   0x7   :  { %s646_s30 = scalar_lea.vmem %s26_s22, 1024  ;;  %p651_p4 = scmp.lt.s32.totalorder %s26_s22, %s26_s22 }
   0x8   :  { %p647_p3 = scmp.ne.s32.totalorder %s26_s22, %s646_s30  ;;  %p652_p5 = scmp.lt.s32.totalorder %s646_s30, %s646_s30 }
   0xa   :  { %p653_p6 = por %p652_p5, %p651_p4 }
   0xc   :  { %p654_p7 = pnand %p653_p6, %p647_p3 }
   0xe   :  { %657 = shalt.err (!%p654_p7)
}
   0xf   :  { %s661_s7 = smov 64   ;;  %s662_s8 = smov 4  }
  0x10   :  { %31 = dma.hbm_to_vmem [thread:$0]  %s780_s4, 1024, %s26_s22, [#allocation3], %s661_s7, %s661_s7, %s662_s8  }
  0x11   :  { %658 = dma.done.wait [#allocation3], 1024  }
  0x12   :  { %659 = vsyncadd [#allocation3], 4294966272  ;;  %v600_v0 = vld [vmem:[%s778_s2] sm:$0xff]   ;;  %v601_v1 = vld [vmem:[%s778_s2 + $0x8] sm:$0xff]   ;;  %vm190_vm0 = vcmask 261120   ;;  %v423_v47 = vlaneseq }
  0x13   :  { %541 = vmatprep.subr.bf16.mxu0 %v600_v0  ;;  %v602_v2 = vld [vmem:[%s778_s2 + $0x10] sm:$0xff]   ;;  %v603_v3 = vld [vmem:[%s778_s2 + $0x18] sm:$0xff]   ;;  %v608_v4 = vld [vmem:[%s777_s1] sm:$0xff]  }
  0x14   :  { %542 = vmatpush3.bf16.msra.mxu0 %v600_v0  ;;  %v604_v5 = vld [vmem:[%s778_s2 + $0x20] sm:$0xff]   ;;  %557 = vmatprep.mubr.bf16.mxu0 %v608_v4  ;;  %v605_v6 = vld [vmem:[%s778_s2 + $0x28] sm:$0xff]   ;;  %v606_v7 = vld [vmem:[%s778_s2 + $0x30] sm:$0xff]   ;;  %v424_v48 = vand.u32 127, %v423_v47 }
  0x15   :  { %543 = vmatprep.subr.bf16.mxu0 %v601_v1  ;;  %v607_v8 = vld [vmem:[%s778_s2 + $0x38] sm:$0xff]   ;;  %v609_v9 = vld [vmem:[%s777_s1 + $0x8] sm:$0xff]   ;;  %v610_v10 = vld [vmem:[%s776_s0] sm:$0xff]  }
  0x16   :  { %565 = vmatprep.mubr.msk.bf16.mxu1 %vm190_vm0, %v610_v10  ;;  %v612_v17 = vld [vmem:[#allocation2] sm:$0xff]   ;;  %v611_v18 = vld [vmem:[%s776_s0 + $0x8] sm:$0xff]   ;;  %v614_v20 = vld [vmem:[#allocation2 + $0x10] sm:$0xff]   ;;  %vm425_vm1 = vcmp.lt.s32.totalorder %v424_v48, 8 }
  0x17   :  { %v613_v19 = vld [vmem:[#allocation2 + $0x8] sm:$0xff]   ;;  %v615_v21 = vld [vmem:[#allocation2 + $0x18] sm:$0xff]   ;;  %v616_v22 = vld [vmem:[#allocation2 + $0x20] sm:$0xff]  }
  0x18   :  { %544 = vmatpush3.bf16.msra.mxu0 %v601_v1  ;;  %v617_v23 = vld [vmem:[#allocation2 + $0x28] sm:$0xff]   ;;  %v618_v24 = vld [vmem:[#allocation2 + $0x30] sm:$0xff]   ;;  %v619_v25 = vld [vmem:[#allocation2 + $0x38] sm:$0xff]  }
  0x19   :  { %545 = vmatprep.subr.bf16.mxu0 %v602_v2  ;;  %v497_v26 = vld [vmem:[%s779_s3] ss:$0 sm:$0xff] }
  0x1a   :  { %v510_v49 = vld [vmem:[%s781_s5] ss:$0 sm:$0xff] }
  0x1c   :  { %546 = vmatpush3.bf16.msra.mxu0 %v602_v2 }
  0x1d   :  { %547 = vmatprep.subr.bf16.mxu0 %v603_v3 }
  0x20   :  { %548 = vmatpush3.bf16.msra.mxu0 %v603_v3 }
  0x21   :  { %549 = vmatprep.subr.bf16.mxu0 %v604_v5 }
  0x24   :  { %550 = vmatpush3.bf16.msra.mxu0 %v604_v5 }
  0x25   :  { %551 = vmatprep.subr.bf16.mxu0 %v605_v6 }
  0x28   :  { %552 = vmatpush3.bf16.msra.mxu0 %v605_v6 }
  0x29   :  { %553 = vmatprep.subr.bf16.mxu0 %v606_v7 }
  0x2c   :  { %554 = vmatpush3.bf16.msra.mxu0 %v606_v7 }
  0x2d   :  { %555 = vmatprep.subr.bf16.mxu0 %v607_v8 }
  0x30   :  { %556 = vmatpush3.bf16.msra.mxu0 %v607_v8 }
  0x33   :  { %558 = vmatmul.mubr.bf16.vlgmr.msra.gmra.mrb[0].mxu0 %v609_v9 }
  0x34   :  { %593 = vmatprep.mubr.msk.bf16.mxu0 %vm190_vm0, %v610_v10 }
 0x106   :  { %v559_v11 = vpop.f32.mrb[0].mxu0 }
 0x107   :  { %v156_v12 = vpop.f32.mrb[1].mxu0 }
 0x108   :  { %v560_v13 = vpop.f32.mrb[2].mxu0 }
 0x109   :  { %v172_v14 = vpack.c.bf16 %v560_v13, %v559_v11  ;;  %v159_v15 = vpop.f32.mrb[3].mxu0 }
 0x10a   :  { %v171_v16 = vpack.c.bf16 %v159_v15, %v156_v12 }
 0x10c   :  { %561 = vmatprep.subr.bf16.mxu1 %v171_v16 }
 0x10d   :  { %562 = vmatpush3.bf16.msra.mxu1 %v171_v16 }
 0x10e   :  { %563 = vmatprep.subr.bf16.mxu1 %v172_v14 }
 0x111   :  { %564 = vmatpush3.bf16.msra.mxu1 %v172_v14 }
 0x112   :  { %569 = vmatprep.subr.bf16.mxu1 %v612_v17 }
 0x114   :  { %566 = vmatmul.mubr.msk.bf16.vlgmr.msra.gmra.mrb[0].mxu1 %vm190_vm0, %v611_v18 }
 0x115   :  { %570 = vmatpush3.bf16.msra.mxu1 %v612_v17 }
 0x116   :  { %571 = vmatprep.subr.bf16.mxu1 %v613_v19 }
 0x119   :  { %572 = vmatpush3.bf16.msra.mxu1 %v613_v19 }
 0x11a   :  { %573 = vmatprep.subr.bf16.mxu1 %v614_v20 }
 0x11d   :  { %574 = vmatpush3.bf16.msra.mxu1 %v614_v20 }
 0x11e   :  { %575 = vmatprep.subr.bf16.mxu1 %v615_v21 }
 0x121   :  { %576 = vmatpush3.bf16.msra.mxu1 %v615_v21 }
 0x122   :  { %577 = vmatprep.subr.bf16.mxu1 %v616_v22 }
 0x125   :  { %578 = vmatpush3.bf16.msra.mxu1 %v616_v22 }
 0x126   :  { %579 = vmatprep.subr.bf16.mxu1 %v617_v23 }
 0x129   :  { %580 = vmatpush3.bf16.msra.mxu1 %v617_v23 }
 0x12a   :  { %581 = vmatprep.subr.bf16.mxu1 %v618_v24 }
 0x12d   :  { %582 = vmatpush3.bf16.msra.mxu1 %v618_v24 }
 0x12e   :  { %583 = vmatprep.subr.bf16.mxu1 %v619_v25 }
 0x131   :  { %584 = vmatpush3.bf16.msra.mxu1 %v619_v25 }
 0x1e7   :  { %v567_v27 = vpop.f32.mrb[0].mxu1 }
 0x1e8   :  { %v240_v28 = vadd.f32 %v567_v27, %v497_v26  ;;  %v231_v29 = vpop.f32.mrb[1].mxu1 }
 0x1e9   :  { %v232_v30 = vadd.f32 %v497_v26, %v231_v29  ;;  %v568_v31 = vpop.f32.mrb[2].mxu1 }
 0x1ea   :  { %v243_v32 = vadd.f32 %v568_v31, %v497_v26  ;;  %v234_v33 = vpop.f32.mrb[3].mxu1  ;;  %v248_v35 = vmax.f32 %v240_v28, 0.0 }
 0x1eb   :  { %v235_v34 = vadd.f32 %v497_v26, %v234_v33  ;;  %v246_v37 = vmax.f32 %v232_v30, 0.0 }
 0x1ec   :  { %v249_v36 = vmax.f32 %v243_v32, 0.0 }
 0x1ed   :  { %v247_v38 = vmax.f32 %v235_v34, 0.0 }
 0x1ee   :  { %v251_v39 = vpack.c.bf16 %v249_v36, %v248_v35 }
 0x1ef   :  { %v250_v40 = vpack.c.bf16 %v247_v38, %v246_v37 }
 0x1f1   :  { %585 = vmatprep.mubr.bf16.mxu1 %v250_v40 }
 0x1f2   :  { %586 = vmatmul.mubr.bf16.vlgmr.msra.gmra.mrb[4].mxu1 %v251_v39 }
 0x2c5   :  { %v587_v41 = vpop.f32.mrb[4].mxu1 }
 0x2c6   :  { %v350_v42 = vpop.f32.mrb[5].mxu1 }
 0x2c7   :  { %v588_v43 = vpop.f32.mrb[6].mxu1 }
 0x2c8   :  { %v366_v44 = vpack.c.bf16 %v588_v43, %v587_v41  ;;  %v353_v45 = vpop.f32.mrb[7].mxu1 }
 0x2c9   :  { %v365_v46 = vpack.c.bf16 %v353_v45, %v350_v42 }
 0x2cb   :  { %589 = vmatprep.subr.bf16.mxu0 %v365_v46 }
 0x2cc   :  { %590 = vmatpush3.bf16.msra.mxu0 %v365_v46 }
 0x2cd   :  { %591 = vmatprep.subr.bf16.mxu0 %v366_v44 }
 0x2d0   :  { %592 = vmatpush3.bf16.msra.mxu0 %v366_v44 }
 0x2d3   :  { %594 = vmatmul.mubr.msk.bf16.vlgmr.msra.gmra.mrb[4].mxu0 %vm190_vm0, %v611_v18 }
 0x3a6   :  { %v595_v50 = vpop.f32.mrb[4].mxu0 }
 0x3a7   :  { %v417_v51 = vadd.f32 %v595_v50, %v510_v49  ;;  %v408_v52 = vpop.f32.mrb[5].mxu0 }
 0x3a8   :  { %v409_v53 = vadd.f32 %v510_v49, %v408_v52  ;;  %v596_v54 = vpop.f32.mrb[6].mxu0 }
 0x3a9   :  { %v420_v55 = vadd.f32 %v596_v54, %v510_v49  ;;  %v411_v56 = vpop.f32.mrb[7].mxu0  ;;  %v428_v57 = vsel %vm425_vm1, %v417_v51, -1e+30 }
 0x3aa   :  { %v412_v58 = vadd.f32 %v510_v49, %v411_v56  ;;  %434 = vmax.xlane.f32.xlu1 %v428_v57  ;;  %v426_v59 = vsel %vm425_vm1, %v409_v53, -1e+30 }
 0x3ab   :  { %430 = vmax.xlane.f32.xlu0 %v426_v59  ;;  %v429_v60 = vsel %vm425_vm1, %v420_v55, -1e+30 }
 0x3ac   :  { %v427_v61 = vsel %vm425_vm1, %v412_v58, -1e+30 }
 0x3ae   :  { %436 = vmax.xlane.f32.xlu1 %v429_v60 }
 0x3af   :  { %432 = vmax.xlane.f32.xlu0 %v427_v61 }
 0x437   :  { %v435_v62 = vpop.xlane.xlu1 %434 }
 0x438   :  { %v440_v63 = vsub.f32 %v428_v57, %v435_v62  ;;  %v431_v0 = vpop.xlane.xlu0 %430 }
 0x439   :  { %v438_v1 = vsub.f32 %v426_v59, %v431_v0 }
 0x43a   :  { %v446_v2 = vmul.f32 1.442695, %v440_v63 }
 0x43b   :  { %v442_v3 = vmul.f32 1.442695, %v438_v1  ;;  %v437_v4 = vpop.xlane.xlu1 %436 }
 0x43c   :  { %v441_v5 = vsub.f32 %v429_v60, %v437_v4  ;;  %v433_v6 = vpop.xlane.xlu0 %432 }
 0x43d   :  { %620 = vpow2.f32 %v442_v3  ;;  %v439_v7 = vsub.f32 %v427_v61, %v433_v6 }
 0x43e   :  { %622 = vpow2.f32 %v446_v2  ;;  %v448_v8 = vmul.f32 1.442695, %v441_v5 }
 0x43f   :  { %v444_v9 = vmul.f32 1.442695, %v439_v7 }
 0x441   :  { %624 = vpow2.f32 %v444_v9 }
 0x442   :  { %626 = vpow2.f32 %v448_v8 }
 0x447   :  { %v621_v10 = vpop.eup %620 }
 0x448   :  { %v450_v11 = vsel %vm425_vm1, %v621_v10, 0.0  ;;  %v623_v12 = vpop.eup %622 }
 0x449   :  { %454 = vadd.xlane.f32.xlu0 %v450_v11  ;;  %v452_v14 = vsel %vm425_vm1, %v623_v12, 0.0 }
 0x44b   :  { %v625_v13 = vpop.eup %624 }
 0x44c   :  { %v451_v15 = vsel %vm425_vm1, %v625_v13, 0.0  ;;  %v627_v16 = vpop.eup %626 }
 0x44d   :  { %458 = vadd.xlane.f32.xlu0 %v452_v14  ;;  %456 = vadd.xlane.f32.xlu1 %v451_v15  ;;  %v453_v17 = vsel %vm425_vm1, %v627_v16, 0.0 }
 0x451   :  { %460 = vadd.xlane.f32.xlu1 %v453_v17 }
 0x4d6   :  { %v455_v18 = vpop.xlane.xlu0 %454 }
 0x4d7   :  { %628 = vlog2.f32 %v455_v18 }
 0x4da   :  { %v457_v19 = vpop.xlane.xlu1 %456  ;;  %v459_v20 = vpop.xlane.xlu0 %458 }
 0x4db   :  { %630 = vlog2.f32 %v457_v19 }
 0x4dc   :  { %632 = vlog2.f32 %v459_v20 }
 0x4de   :  { %v461_v21 = vpop.xlane.xlu1 %460 }
 0x4df   :  { %634 = vlog2.f32 %v461_v21 }
 0x4e1   :  { %v629_v22 = vpop.eup %628 }
 0x4e2   :  { %v463_v23 = vmul.f32 0.6931472, %v629_v22 }
 0x4e4   :  { %v470_v24 = vadd.f32 %v463_v23, %v431_v0 }
 0x4e5   :  { %v631_v25 = vpop.eup %630 }
 0x4e6   :  { %v633_v26 = vpop.eup %632  ;;  %v474_v27 = vsub.f32 %v426_v59, %v470_v24  ;;  %v465_v28 = vmul.f32 0.6931472, %v631_v25 }
 0x4e7   :  { %v467_v29 = vmul.f32 0.6931472, %v633_v26 }
 0x4e8   :  { %478 = vst [vmem:[%s782_s6] sm:$0xff] %v474_v27  ;;  %v471_v30 = vadd.f32 %v465_v28, %v433_v6 }
 0x4e9   :  { %v635_v31 = vpop.eup %634  ;;  %v472_v32 = vadd.f32 %v467_v29, %v435_v62 }
 0x4ea   :  { %v475_v33 = vsub.f32 %v427_v61, %v471_v30  ;;  %v469_v34 = vmul.f32 0.6931472, %v635_v31 }
 0x4eb   :  { %v476_v35 = vsub.f32 %v428_v57, %v472_v32 }
 0x4ec   :  { %479 = vst [vmem:[%s782_s6 + $0x8] sm:$0xff] %v475_v33  ;;  %v473_v36 = vadd.f32 %v469_v34, %v437_v4 }
 0x4ed   :  { %480 = vst [vmem:[%s782_s6 + $0x10] sm:$0xff] %v476_v35 }
 0x4ee   :  { %v477_v37 = vsub.f32 %v429_v60, %v473_v36 }
 0x4f0   :  { %481 = vst [vmem:[%s782_s6 + $0x18] sm:$0xff] %v477_v37 }
 0x4f1   :  { %486 = vsyncpa [#allocation3], 1 }

</bundles_post_ra>
